<compile_context>
chip_gen: v6e
topology: v6e:2x2x1
jax: 0.10.0
libtpu: 0.0.40
codegen_flags: <defaults>
</compile_context>

<pallas_src>
import jax
import jax.numpy as jnp
from jax.experimental import pallas as pl
from jax.experimental.pallas import tpu as pltpu

LANE = 128  # TPU lane width


def dqn_kernel(x_ref, w1_ref, b1_ref, w2_ref, b2_ref, w3_ref, b3_ref, o_ref):
    """Fused MLP (2 hidden layers, ReLU) + action head + softmax.

    x_ref:  (tm, D_in)  f32 activation tile (last history frame, flattened)
    w*:     bf16 weights (lane-padded), b*: f32 biases (lane-padded)
    o_ref:  (tm, A_pad) f32 probabilities (padded lanes ~0)
    """
    # Cast activation to bf16 for the MXU; in production feed bf16 directly.
    x = x_ref[...].astype(jnp.bfloat16)                              # (tm, D_in)

    # fc_net layer 1: Linear + ReLU (f32 accumulate, f32 epilogue)
    h1 = jnp.dot(x, w1_ref[...], preferred_element_type=jnp.float32)
    h1 = jnp.maximum(h1 + b1_ref[...], 0.0)                          # (tm, Hp)

    # fc_net layer 2: Linear + ReLU
    h2 = jnp.dot(h1.astype(jnp.bfloat16), w2_ref[...],
                 preferred_element_type=jnp.float32)
    h2 = jnp.maximum(h2 + b2_ref[...], 0.0)                          # (tm, Hp)

    # action_head: Linear (padded action lanes get bias -1e30 -> exp == 0)
    logits = jnp.dot(h2.astype(jnp.bfloat16), w3_ref[...],
                     preferred_element_type=jnp.float32)
    logits = logits + b3_ref[...]                                    # (tm, Ap)

    # numerically stable softmax over the (lane-dense) last dim
    m = jnp.max(logits, axis=-1, keepdims=True)
    e = jnp.exp(logits - m)
    denom = jnp.sum(e, axis=-1, keepdims=True)
    o_ref[...] = e * pl.reciprocal(denom, approx=True)


def prepare_params(params):
    """One-time packing: lane-pad hidden/action dims to 128, cast weights bf16.

    Padding is exact: padded hidden columns have zero weights/bias so their
    ReLU activations are 0 and contribute nothing downstream; padded action
    lanes get bias -1e30 so softmax assigns them ~0 probability.
    """
    w1, b1 = params["w1"], params["b1"]
    w2, b2 = params["w2"], params["b2"]
    w3, b3 = params["w3"], params["b3"]
    d_in, hidden = w1.shape
    n_actions = w3.shape[1]
    h_pad = max(LANE, -(-hidden // LANE) * LANE)
    a_pad = max(LANE, -(-n_actions // LANE) * LANE)

    def pad2(m, rows, cols, fill=0.0):
        out = jnp.full((rows, cols), fill, jnp.float32)
        return out.at[: m.shape[0], : m.shape[1]].set(m)

    return {
        "w1": pad2(w1, d_in, h_pad).astype(jnp.bfloat16),
        "b1": pad2(b1, 1, h_pad),
        "w2": pad2(w2, h_pad, h_pad).astype(jnp.bfloat16),
        "b2": pad2(b2, 1, h_pad),
        "w3": pad2(w3, h_pad, a_pad).astype(jnp.bfloat16),
        "b3": pad2(b3, 1, a_pad, fill=-1e30),
        "n_actions": n_actions,
    }


def dqn_forward(x, packed):
    """x: (B, T, H, W) float32.  packed: dict from prepare_params."""
    B, T, Himg, Wimg = x.shape
    d_in = Himg * Wimg
    # Metadata-only reshape; the last-frame select happens inside the
    # pallas_call as a DMA column offset (block index T-1).
    x2d = x.reshape(B, T * d_in)

    w1, b1 = packed["w1"], packed["b1"]
    w2, b2 = packed["w2"], packed["b2"]
    w3, b3 = packed["w3"], packed["b3"]
    h_pad = w1.shape[1]
    a_pad = w3.shape[1]
    n_actions = packed["n_actions"]

    # Batch tile: whole batch if small, else 512-row tiles (>=85% HBM roofline).
    tm = B if B <= 512 else 512
    nb = pl.cdiv(B, tm)

    const = lambda i: (0, 0)   # weights/biases stay VMEM-resident across steps

    out = pl.pallas_call(
        dqn_kernel,
        out_shape=jax.ShapeDtypeStruct((B, a_pad), jnp.float32),
        grid=(nb,),
        in_specs=[
            # column-block (T-1) of the (B, T*D_in) view == last frame slab
            pl.BlockSpec((tm, d_in), lambda i: (i, T - 1)),
            pl.BlockSpec((d_in, h_pad), const),
            pl.BlockSpec((1, h_pad), const),
            pl.BlockSpec((h_pad, h_pad), const),
            pl.BlockSpec((1, h_pad), const),
            pl.BlockSpec((h_pad, a_pad), const),
            pl.BlockSpec((1, a_pad), const),
        ],
        out_specs=pl.BlockSpec((tm, a_pad), lambda i: (i, 0)),
        compiler_params=pltpu.CompilerParams(
            dimension_semantics=("parallel",)),   # shards batch across TCs on v7x
    )(x2d, w1, b1, w2, b2, w3, b3)

    # Drop the padded (always ~0-probability) action lanes.
    return out[:, :n_actions]


def init_params(key, d_in, hidden, outputs):
    ks = jax.random.split(key, 6)
    scale1 = 1.0 / jnp.sqrt(d_in)
    scale2 = 1.0 / jnp.sqrt(hidden)
    return {
        "w1": jax.random.uniform(ks[0], (d_in, hidden), jnp.float32, -scale1, scale1),
        "b1": jax.random.uniform(ks[1], (1, hidden), jnp.float32, -scale1, scale1),
        "w2": jax.random.uniform(ks[2], (hidden, hidden), jnp.float32, -scale2, scale2),
        "b2": jax.random.uniform(ks[3], (1, hidden), jnp.float32, -scale2, scale2),
        "w3": jax.random.uniform(ks[4], (hidden, outputs), jnp.float32, -scale2, scale2),
        "b3": jax.random.uniform(ks[5], (1, outputs), jnp.float32, -scale2, scale2),
    }


if __name__ == "__main__":
    key = jax.random.PRNGKey(0)
    k_x, k_p = jax.random.split(key)

    B, T, H, W = 2, 4, 16, 16          # batch=2, max_history_length=4, 16x16 frames
    hidden = 32                        # fc_net.nr_hidden_units
    outputs = 8                        # number of actions
    d_in = H * W

    x = jax.random.normal(k_x, (B, T, H, W), dtype=jnp.float32)
    params = init_params(k_p, d_in, hidden, outputs)
    packed = prepare_params(params)    # one-time pad + bf16 cast

    probs = dqn_forward(x, packed)
    jax.block_until_ready(probs)

    # Reference in plain JAX using the same bf16 matmul operands.
    bf = jnp.bfloat16
    cx = x[:, -1].reshape(B, -1)
    h1 = jnp.maximum(jnp.dot(cx.astype(bf), params["w1"].astype(bf),
                             preferred_element_type=jnp.float32) + params["b1"], 0.0)
    h2 = jnp.maximum(jnp.dot(h1.astype(bf), params["w2"].astype(bf),
                             preferred_element_type=jnp.float32) + params["b2"], 0.0)
    logits = jnp.dot(h2.astype(bf), params["w3"].astype(bf),
                     preferred_element_type=jnp.float32) + params["b3"]
    ref = jax.nn.softmax(logits, axis=-1)

    assert probs.shape == (B, outputs)
    assert jnp.allclose(probs, ref, atol=2e-3), "mismatch vs reference"
    assert jnp.allclose(jnp.sum(probs, axis=-1), 1.0, atol=2e-3)

    print("KERNEL_OK")
</pallas_src>

<mosaic_0001>
module attributes {stable_mosaic.version = 11 : i64} {
  func.func @dqn_kernel(%arg0: i32, %arg1: memref<2x256xf32, #tpu.memory_space<vmem>>, %arg2: memref<256x128xbf16, #tpu.memory_space<vmem>>, %arg3: memref<1x128xf32, #tpu.memory_space<vmem>>, %arg4: memref<128x128xbf16, #tpu.memory_space<vmem>>, %arg5: memref<1x128xf32, #tpu.memory_space<vmem>>, %arg6: memref<128x128xbf16, #tpu.memory_space<vmem>>, %arg7: memref<1x128xf32, #tpu.memory_space<vmem>>, %arg8: memref<2x128xf32, #tpu.memory_space<vmem>>) attributes {dimension_semantics = [#tpu.dimension_semantics<parallel>], iteration_bounds = array<i64: 1>, scalar_prefetch = 0 : i64, scratch_operands = 0 : i64, tpu.core_type = #tpu.core_type<tc>, window_params = [{transform_indices = @transform_0, window_bounds = array<i64: 2, 256>}, {pipeline_mode = #tpu.pipeline_mode<synchronous>, transform_indices = @transform_1, window_bounds = array<i64: 256, 128>}, {pipeline_mode = #tpu.pipeline_mode<synchronous>, transform_indices = @transform_2, window_bounds = array<i64: 1, 128>}, {pipeline_mode = #tpu.pipeline_mode<synchronous>, transform_indices = @transform_3, window_bounds = array<i64: 128, 128>}, {pipeline_mode = #tpu.pipeline_mode<synchronous>, transform_indices = @transform_4, window_bounds = array<i64: 1, 128>}, {pipeline_mode = #tpu.pipeline_mode<synchronous>, transform_indices = @transform_5, window_bounds = array<i64: 128, 128>}, {pipeline_mode = #tpu.pipeline_mode<synchronous>, transform_indices = @transform_6, window_bounds = array<i64: 1, 128>}, {transform_indices = @transform_7, window_bounds = array<i64: 2, 128>}]} {
    %c0 = arith.constant 0 : index
    %c0_0 = arith.constant 0 : index
    %0 = vector.load %arg1[%c0, %c0_0] : memref<2x256xf32, #tpu.memory_space<vmem>>, vector<2x256xf32>
    %1 = arith.truncf %0 : vector<2x256xf32> to vector<2x256xbf16>
    %c0_1 = arith.constant 0 : index
    %c0_2 = arith.constant 0 : index
    %2 = vector.load %arg2[%c0_1, %c0_2] : memref<256x128xbf16, #tpu.memory_space<vmem>>, vector<256x128xbf16>
    %cst = arith.constant dense<0.000000e+00> : vector<2x128xf32>
    %3 = tpu.matmul %1, %2, %cst {dimension_numbers = #tpu.dot_dimension_numbers<[1], [0], [0], [1], [0, 0, 1, 1], [], []>} : vector<2x256xbf16>, vector<256x128xbf16>, vector<2x128xf32> -> vector<2x128xf32>
    %c0_3 = arith.constant 0 : index
    %c0_4 = arith.constant 0 : index
    %4 = vector.load %arg3[%c0_3, %c0_4] : memref<1x128xf32, #tpu.memory_space<vmem>>, vector<1x128xf32>
    %5 = vector.broadcast %4 : vector<1x128xf32> to vector<2x128xf32>
    %6 = arith.addf %3, %5 : vector<2x128xf32>
    %cst_5 = arith.constant 0.000000e+00 : f32
    %7 = vector.broadcast %cst_5 : f32 to vector<2x128xf32>
    %8 = arith.maximumf %6, %7 : vector<2x128xf32>
    %9 = arith.truncf %8 : vector<2x128xf32> to vector<2x128xbf16>
    %c0_6 = arith.constant 0 : index
    %c0_7 = arith.constant 0 : index
    %10 = vector.load %arg4[%c0_6, %c0_7] : memref<128x128xbf16, #tpu.memory_space<vmem>>, vector<128x128xbf16>
    %cst_8 = arith.constant dense<0.000000e+00> : vector<2x128xf32>
    %11 = tpu.matmul %9, %10, %cst_8 {dimension_numbers = #tpu.dot_dimension_numbers<[1], [0], [0], [1], [0, 0, 1, 1], [], []>} : vector<2x128xbf16>, vector<128x128xbf16>, vector<2x128xf32> -> vector<2x128xf32>
    %c0_9 = arith.constant 0 : index
    %c0_10 = arith.constant 0 : index
    %12 = vector.load %arg5[%c0_9, %c0_10] : memref<1x128xf32, #tpu.memory_space<vmem>>, vector<1x128xf32>
    %13 = vector.broadcast %12 : vector<1x128xf32> to vector<2x128xf32>
    %14 = arith.addf %11, %13 : vector<2x128xf32>
    %cst_11 = arith.constant 0.000000e+00 : f32
    %15 = vector.broadcast %cst_11 : f32 to vector<2x128xf32>
    %16 = arith.maximumf %14, %15 : vector<2x128xf32>
    %17 = arith.truncf %16 : vector<2x128xf32> to vector<2x128xbf16>
    %c0_12 = arith.constant 0 : index
    %c0_13 = arith.constant 0 : index
    %18 = vector.load %arg6[%c0_12, %c0_13] : memref<128x128xbf16, #tpu.memory_space<vmem>>, vector<128x128xbf16>
    %cst_14 = arith.constant dense<0.000000e+00> : vector<2x128xf32>
    %19 = tpu.matmul %17, %18, %cst_14 {dimension_numbers = #tpu.dot_dimension_numbers<[1], [0], [0], [1], [0, 0, 1, 1], [], []>} : vector<2x128xbf16>, vector<128x128xbf16>, vector<2x128xf32> -> vector<2x128xf32>
    %c0_15 = arith.constant 0 : index
    %c0_16 = arith.constant 0 : index
    %20 = vector.load %arg7[%c0_15, %c0_16] : memref<1x128xf32, #tpu.memory_space<vmem>>, vector<1x128xf32>
    %21 = vector.broadcast %20 : vector<1x128xf32> to vector<2x128xf32>
    %22 = arith.addf %19, %21 : vector<2x128xf32>
    %cst_17 = arith.constant dense<0xFF800000> : vector<2xf32>
    %23 = vector.multi_reduction <maximumf>, %22, %cst_17 [1] : vector<2x128xf32> to vector<2xf32>
    %24 = vector.shape_cast %23 : vector<2xf32> to vector<2x1xf32>
    %25 = vector.broadcast %24 : vector<2x1xf32> to vector<2x128xf32>
    %26 = arith.subf %22, %25 : vector<2x128xf32>
    %27 = math.exp %26 : vector<2x128xf32>
    %cst_18 = arith.constant dense<0.000000e+00> : vector<2xf32>
    %28 = vector.multi_reduction <add>, %27, %cst_18 [1] : vector<2x128xf32> to vector<2xf32>
    %29 = vector.shape_cast %28 : vector<2xf32> to vector<2x1xf32>
    %30 = tpu.reciprocal %29 {approx = true} : vector<2x1xf32> -> vector<2x1xf32>
    %31 = vector.broadcast %30 : vector<2x1xf32> to vector<2x128xf32>
    %32 = arith.mulf %27, %31 : vector<2x128xf32>
    %c0_19 = arith.constant 0 : index
    %c0_20 = arith.constant 0 : index
    %33 = vector.load %arg8[%c0_19, %c0_20] : memref<2x128xf32, #tpu.memory_space<vmem>>, vector<2x128xf32>
    tpu.vector_store %arg8[%c0_19, %c0_20], %32 {strides = array<i32>} : memref<2x128xf32, #tpu.memory_space<vmem>>, vector<2x128xf32>,
    return
  }
  func.func @transform_0(%arg0: i32) -> (i32, i32) {
    %c3_i32 = arith.constant 3 : i32
    %c0_i32 = arith.constant 0 : i32
    return %arg0, %c3_i32 : i32, i32
  }
  func.func @transform_1(%arg0: i32) -> (i32, i32) {
    %c0_i32 = arith.constant 0 : i32
    %c0_i32_0 = arith.constant 0 : i32
    %c0_i32_1 = arith.constant 0 : i32
    return %c0_i32, %c0_i32_0 : i32, i32
  }
  func.func @transform_2(%arg0: i32) -> (i32, i32) {
    %c0_i32 = arith.constant 0 : i32
    %c0_i32_0 = arith.constant 0 : i32
    %c0_i32_1 = arith.constant 0 : i32
    return %c0_i32, %c0_i32_0 : i32, i32
  }
  func.func @transform_3(%arg0: i32) -> (i32, i32) {
    %c0_i32 = arith.constant 0 : i32
    %c0_i32_0 = arith.constant 0 : i32
    %c0_i32_1 = arith.constant 0 : i32
    return %c0_i32, %c0_i32_0 : i32, i32
  }
  func.func @transform_4(%arg0: i32) -> (i32, i32) {
    %c0_i32 = arith.constant 0 : i32
    %c0_i32_0 = arith.constant 0 : i32
    %c0_i32_1 = arith.constant 0 : i32
    return %c0_i32, %c0_i32_0 : i32, i32
  }
  func.func @transform_5(%arg0: i32) -> (i32, i32) {
    %c0_i32 = arith.constant 0 : i32
    %c0_i32_0 = arith.constant 0 : i32
    %c0_i32_1 = arith.constant 0 : i32
    return %c0_i32, %c0_i32_0 : i32, i32
  }
  func.func @transform_6(%arg0: i32) -> (i32, i32) {
    %c0_i32 = arith.constant 0 : i32
    %c0_i32_0 = arith.constant 0 : i32
    %c0_i32_1 = arith.constant 0 : i32
    return %c0_i32, %c0_i32_0 : i32, i32
  }
  func.func @transform_7(%arg0: i32) -> (i32, i32) {
    %c0_i32 = arith.constant 0 : i32
    %c0_i32_0 = arith.constant 0 : i32
    return %arg0, %c0_i32 : i32, i32
  }
}

</mosaic_0001>

<bundles_post_ra>
// kernel: tpu_custom_call.1
= control target key start
LH: loop header
LB: loop body
LE: loop exit
PB: predicated region body
PF: predicated region fallthrough
CT: control target
= control target key end

     0   :  { %12 = vsyncpa [#allocation3], 0  ;;  %s899_s0 = inlined_call_operand.hbm [shape: f32[2,1024], index: 0, kind: input, shape index: {}]   ;;  %s900_s1 = inlined_call_operand.hbm [shape: bf16[256,128], index: 1, kind: input, shape index: {}]   ;;  %s901_s2 = inlined_call_operand.vmem [shape: f32[1,128], index: 2, kind: input, shape index: {}]   ;;  %s902_s3 = inlined_call_operand.hbm [shape: bf16[128,128], index: 3, kind: input, shape index: {}]   ;;  %s903_s4 = inlined_call_operand.vmem [shape: f32[1,128], index: 4, kind: input, shape index: {}]   ;;  %s904_s5 = inlined_call_operand.hbm [shape: bf16[128,128], index: 5, kind: input, shape index: {}]   ;;  %s905_s6 = inlined_call_operand.vmem [shape: f32[1,128], index: 6, kind: input, shape index: {}]   ;;  %s906_s7 = inlined_call_operand.hbm [shape: f32[2,128], index: 7, kind: output, shape index: {}]  }
   0x1   :  { %13 = vsyncpa [#allocation6], 0 }
   0x2   :  { %14 = vsyncpa [#allocation9], 0 }
   0x3   :  { %15 = vsyncpa [#allocation4], 0  ;;  %s799_s24 = smov [#allocation5]   ;;  %s21_s28 = scalar_lea.hbm %s899_s0, 192 }
   0x4   :  { %s32_s25 = sshll.u32 %s799_s24, 4  ;;  %s33_s25 = int_to_ptr.vmem [resolvable:$true] %s32_s25 }
   0x5   :  { %s696_s29 = scalar_lea.vmem %s33_s25, 2048  ;;  %p701_p1 = scmp.lt.s32.totalorder %s33_s25, %s33_s25 }
   0x6   :  { %p697_p0 = scmp.ne.s32.totalorder %s33_s25, %s696_s29  ;;  %p702_p2 = scmp.lt.s32.totalorder %s696_s29, %s696_s29 }
   0x8   :  { %p703_p3 = por %p702_p2, %p701_p1 }
   0xa   :  { %p704_p4 = pnand %p703_p3, %p697_p0 }
   0xc   :  { %707 = shalt.err (!%p704_p4)
}
   0xd   :  { %s800_s30 = smov 64   ;;  %s801_s8 = smov 4  }
   0xe   :  { %38 = dma.hbm_to_vmem [thread:$0]  %s900_s1, 2048, %s33_s25, [#allocation6], %s800_s30, %s800_s30, %s801_s8  }
   0xf   :  { %s802_s11 = smov [#allocation2]   ;;  %s803_s13 = smov [#allocation7]  }
  0x10   :  { %s23_s12 = sshll.u32 %s802_s11, 4  ;;  %s46_s0 = sshll.u32 %s803_s13, 4  ;;  %s24_s12 = int_to_ptr.vmem [resolvable:$true] %s23_s12  ;;  %s47_s0 = int_to_ptr.vmem [resolvable:$true] %s46_s0 }
  0x11   :  { %s718_s14 = scalar_lea.vmem %s24_s12, 64  ;;  %p723_p6 = scmp.lt.s32.totalorder %s24_s12, %s24_s12 }
  0x12   :  { %p719_p5 = scmp.ne.s32.totalorder %s24_s12, %s718_s14  ;;  %p724_p7 = scmp.lt.s32.totalorder %s718_s14, %s718_s14 }
  0x14   :  { %p725_p8 = por %p724_p7, %p723_p6 }
  0x16   :  { %p726_p9 = pnand %p725_p8, %p719_p5 }
  0x18   :  { %729 = shalt.err (!%p726_p9)
}
  0x19   :  { %26 = dma.hbm_to_vmem [thread:$0]  %s21_s28, 64, %s24_s12, [#allocation3]  }
  0x1a   :  { %s739_s15 = scalar_lea.vmem %s47_s0, 1024  ;;  %p744_p11 = scmp.lt.s32.totalorder %s47_s0, %s47_s0 }
  0x1b   :  { %p740_p10 = scmp.ne.s32.totalorder %s47_s0, %s739_s15  ;;  %p745_p12 = scmp.lt.s32.totalorder %s739_s15, %s739_s15 }
  0x1d   :  { %p746_p13 = por %p745_p12, %p744_p11 }
  0x1f   :  { %p747_p0 = pnand %p746_p13, %p740_p10 }
  0x21   :  { %750 = shalt.err (!%p747_p0)
}
  0x22   :  { %52 = dma.hbm_to_vmem [thread:$0]  %s902_s3, 1024, %s47_s0, [#allocation6], %s800_s30, %s800_s30, %s801_s8  }
  0x23   :  { %s804_s17 = smov [#allocation8]  }
  0x24   :  { %s60_s18 = sshll.u32 %s804_s17, 4  ;;  %s61_s18 = int_to_ptr.vmem [resolvable:$true] %s60_s18 }
  0x25   :  { %s759_s19 = scalar_lea.vmem %s61_s18, 1024  ;;  %p764_p2 = scmp.lt.s32.totalorder %s61_s18, %s61_s18 }
  0x26   :  { %p760_p1 = scmp.ne.s32.totalorder %s61_s18, %s759_s19  ;;  %p765_p3 = scmp.lt.s32.totalorder %s759_s19, %s759_s19 }
  0x28   :  { %p766_p4 = por %p765_p3, %p764_p2 }
  0x2a   :  { %p767_p5 = pnand %p766_p4, %p760_p1 }
  0x2c   :  { %770 = shalt.err (!%p767_p5)
}
  0x2d   :  { %66 = dma.hbm_to_vmem [thread:$0]  %s904_s5, 1024, %s61_s18, [#allocation9], %s800_s30, %s800_s30, %s801_s8  }
  0x2e   :  { %791 = dma.done.wait [#allocation3], 64  }
  0x2f   :  { %792 = vsyncadd [#allocation3], 4294967232 }
  0x30   :  { %793 = dma.done.wait [#allocation6], 3072  }
  0x31   :  { %794 = vsyncadd [#allocation6], 4294964224 }
  0x32   :  { %795 = dma.done.wait [#allocation9], 1024  }
  0x33   :  { %796 = vsyncadd [#allocation9], 4294966272  ;;  %v805_v0 = vmov 0.0   ;;  %v652_v1 = vld [vmem:[#allocation5 + $0x78] sm:$0xff]   ;;  %v654_v3 = vld [vmem:[#allocation5 + $0x70] sm:$0xff]   ;;  %vm806_vm0 = vmmov 0  }
  0x34   :  { %603 = vmatprep.subr.bf16.mxu1 %v805_v0  ;;  %v653_v2 = vld [vmem:[#allocation5 + $0x38] sm:$0xff]   ;;  %563 = vmatprep.subr.bf16.mxu0 %v652_v1  ;;  %v655_v4 = vld [vmem:[#allocation5 + $0x30] sm:$0xff]   ;;  %v656_v5 = vld [vmem:[#allocation5 + $0x68] sm:$0xff]   ;;  %vm497_vm1 = vcmask 1041408  }
  0x35   :  { %564 = vmatpush3.bf16.msra.mxu0 %v653_v2  ;;  %v657_v6 = vld [vmem:[#allocation5 + $0x28] sm:$0xff]   ;;  %v658_v7 = vld [vmem:[#allocation5 + $0x60] sm:$0xff]   ;;  %v660_v9 = vld [vmem:[#allocation5 + $0x58] sm:$0xff]   ;;  %619 = vmatprep.mubr.msk.bf16.mxu1 %vm806_vm0, %v805_v0 }
  0x36   :  { %565 = vmatprep.subr.bf16.mxu0 %v654_v3  ;;  %v659_v8 = vld [vmem:[#allocation5 + $0x20] sm:$0xff]   ;;  %v661_v10 = vld [vmem:[#allocation5 + $0x18] sm:$0xff]   ;;  %v662_v11 = vld [vmem:[#allocation5 + $0x50] sm:$0xff]  }
  0x37   :  { %v527_v12 = vld.sshfl [vmem:[#allocation2] sm:$0x33 pattern:$0x76325410]  ;;  %v663_v15 = vld [vmem:[#allocation5 + $0x10] sm:$0xff]   ;;  %v664_v18 = vld [vmem:[#allocation5 + $0x48] sm:$0xff]  }
  0x38   :  { %v91_v13 = vcombine.high %v527_v12, %v527_v12  ;;  %v668_v14 = vld [vmem:[#allocation7 + $0x38] sm:$0xff]   ;;  %v669_v17 = vld [vmem:[#allocation7 + $0x30] sm:$0xff]   ;;  %v665_v19 = vld [vmem:[#allocation5 + $0x8] sm:$0xff]   ;;  %v94_v24 = vpack.c.bf16 %v527_v12, %v527_v12 }
  0x39   :  { %566 = vmatpush3.bf16.msra.mxu0 %v655_v4  ;;  %604 = vmatpush3.bf16.msra.mxu1 %v668_v14  ;;  %v670_v20 = vld [vmem:[#allocation7 + $0x28] sm:$0xff]   ;;  %v666_v21 = vld [vmem:[#allocation5 + $0x40] sm:$0xff]   ;;  %v672_v25 = vld [vmem:[#allocation7 + $0x18] sm:$0xff]  }
  0x3a   :  { %567 = vmatprep.subr.bf16.mxu0 %v656_v5  ;;  %v95_v16 = vpack.c.bf16 %v91_v13, %v91_v13  ;;  %605 = vmatprep.subr.bf16.mxu1 %v805_v0  ;;  %v667_v22 = vld [vmem:[#allocation5] sm:$0xff]   ;;  %v673_v26 = vld [vmem:[#allocation7 + $0x10] sm:$0xff]   ;;  %v674_v27 = vld [vmem:[#allocation7 + $0x8] sm:$0xff]  }
  0x3b   :  { %v671_v23 = vld [vmem:[#allocation7 + $0x20] sm:$0xff]   ;;  %v676_v29 = vld [vmem:[#allocation8 + $0x38] sm:$0xff]   ;;  %v677_v30 = vld [vmem:[#allocation8 + $0x30] sm:$0xff]  }
  0x3c   :  { %263 = vmatprep.mubr.bf16.mxu0 %v95_v16  ;;  %v675_v28 = vld [vmem:[#allocation7] sm:$0xff]   ;;  %v678_v31 = vld [vmem:[#allocation8 + $0x28] sm:$0xff]   ;;  %v680_v33 = vld [vmem:[#allocation8 + $0x18] sm:$0xff]  }
  0x3d   :  { %568 = vmatpush3.bf16.msra.mxu0 %v657_v6  ;;  %606 = vmatpush3.bf16.msra.mxu1 %v669_v17  ;;  %v679_v32 = vld [vmem:[#allocation8 + $0x20] sm:$0xff]   ;;  %v681_v34 = vld [vmem:[#allocation8 + $0x10] sm:$0xff]   ;;  %v528_v36 = vld [vmem:[%s901_s2] ss:$0 sm:$0xff] }
  0x3e   :  { %569 = vmatprep.subr.bf16.mxu0 %v658_v7  ;;  %607 = vmatprep.subr.bf16.mxu1 %v805_v0  ;;  %v682_v44 = vld [vmem:[#allocation8 + $0x8] sm:$0xff]   ;;  %v683_v45 = vld [vmem:[#allocation8] sm:$0xff]   ;;  %v545_v46 = vld [vmem:[%s903_s4] ss:$0 sm:$0xff]  ;;  %s807_s4 = smov [#allocation10]  }
  0x3f   :  { %v554_v54 = vld [vmem:[%s905_s6] ss:$0 sm:$0xff]  ;;  %s516_s25 = sshll.u32 %s807_s4, 4  ;;  %s517_s25 = int_to_ptr.vmem [resolvable:$true] %s516_s25 }
  0x40   :  { %s771_s6 = scalar_lea.vmem %s517_s25, 32  ;;  %p776_p7 = scmp.lt.s32.totalorder %s517_s25, %s517_s25 }
  0x41   :  { %570 = vmatpush3.bf16.msra.mxu0 %v659_v8  ;;  %608 = vmatpush3.bf16.msra.mxu1 %v670_v20  ;;  %p772_p6 = scmp.ne.s32.totalorder %s517_s25, %s771_s6  ;;  %p777_p8 = scmp.lt.s32.totalorder %s771_s6, %s771_s6 }
  0x42   :  { %571 = vmatprep.subr.bf16.mxu0 %v660_v9  ;;  %609 = vmatprep.subr.bf16.mxu1 %v805_v0 }
  0x43   :  { %p778_p9 = por %p777_p8, %p776_p7 }
  0x45   :  { %572 = vmatpush3.bf16.msra.mxu0 %v661_v10  ;;  %610 = vmatpush3.bf16.msra.mxu1 %v671_v23  ;;  %p779_p10 = pnand %p778_p9, %p772_p6 }
  0x46   :  { %573 = vmatprep.subr.bf16.mxu0 %v662_v11  ;;  %611 = vmatprep.subr.bf16.mxu1 %v805_v0 }
  0x49   :  { %574 = vmatpush3.bf16.msra.mxu0 %v663_v15  ;;  %612 = vmatpush3.bf16.msra.mxu1 %v672_v25 }
  0x4a   :  { %575 = vmatprep.subr.bf16.mxu0 %v664_v18  ;;  %613 = vmatprep.subr.bf16.mxu1 %v805_v0 }
  0x4d   :  { %576 = vmatpush3.bf16.msra.mxu0 %v665_v19  ;;  %614 = vmatpush3.bf16.msra.mxu1 %v673_v26 }
  0x4e   :  { %577 = vmatprep.subr.bf16.mxu0 %v666_v21  ;;  %615 = vmatprep.subr.bf16.mxu1 %v805_v0 }
  0x51   :  { %578 = vmatpush3.bf16.msra.mxu0 %v667_v22  ;;  %616 = vmatpush3.bf16.msra.mxu1 %v674_v27 }
  0x52   :  { %623 = vmatprep.subr.bf16.mxu0 %v805_v0  ;;  %617 = vmatprep.subr.bf16.mxu1 %v805_v0 }
  0x54   :  { %264 = vmatmul.mubr.bf16.vlgmr.msra.gmra.mxu0 %v94_v24 }
  0x55   :  { %618 = vmatpush3.bf16.msra.mxu1 %v675_v28  ;;  %639 = vmatprep.mubr.msk.bf16.mxu0 %vm806_vm0, %v805_v0 }
  0x56   :  { %624 = vmatpush3.bf16.msra.mxu0 %v676_v29 }
  0x57   :  { %625 = vmatprep.subr.bf16.mxu0 %v805_v0 }
  0x5a   :  { %626 = vmatpush3.bf16.msra.mxu0 %v677_v30 }
  0x5b   :  { %627 = vmatprep.subr.bf16.mxu0 %v805_v0 }
  0x5e   :  { %628 = vmatpush3.bf16.msra.mxu0 %v678_v31 }
  0x5f   :  { %629 = vmatprep.subr.bf16.mxu0 %v805_v0 }
  0x62   :  { %630 = vmatpush3.bf16.msra.mxu0 %v679_v32 }
  0x63   :  { %631 = vmatprep.subr.bf16.mxu0 %v805_v0 }
  0x66   :  { %632 = vmatpush3.bf16.msra.mxu0 %v680_v33 }
  0x67   :  { %633 = vmatprep.subr.bf16.mxu0 %v805_v0 }
  0x6a   :  { %634 = vmatpush3.bf16.msra.mxu0 %v681_v34 }
  0x6b   :  { %635 = vmatprep.subr.bf16.mxu0 %v805_v0 }
  0x6e   :  { %636 = vmatpush3.bf16.msra.mxu0 %v682_v44 }
  0x6f   :  { %637 = vmatprep.subr.bf16.mxu0 %v805_v0 }
  0x72   :  { %638 = vmatpush3.bf16.msra.mxu0 %v683_v45 }
 0x114   :  { %v579_v35 = vpop.f32.mrf.mxu0 }
 0x116   :  { %v580_v37 = vpop.f32.mrf.mxu0 }
 0x117   :  { %v581_v38 = vadd.f32 %v580_v37, %v579_v35 }
 0x118   :  { %v582_v39 = vpop.f32.mrf.mxu0 }
 0x119   :  { %v266_v40 = vadd.f32 %v581_v38, %v528_v36 }
 0x11a   :  { %v583_v41 = vpop.f32.mrf.mxu0 }
 0x11b   :  { %v271_v42 = vmax.f32 %v266_v40, 0.0 }
 0x11d   :  { %v272_v43 = vpack.c.bf16 %v271_v42, %v271_v42 }
 0x11f   :  { %620 = vmatmul.mubr.bf16.vlgmr.msra.gmra.mxu1 %v272_v43 }
 0x1df   :  { %v378_v47 = vpop.f32.mrf.mxu1 }
 0x1e0   :  { %v379_v48 = vadd.f32 %v545_v46, %v378_v47 }
 0x1e1   :  { %v621_v49 = vpop.f32.mrf.mxu1 }
 0x1e2   :  { %v384_v50 = vmax.f32 %v379_v48, 0.0 }
 0x1e3   :  { %v381_v51 = vpop.f32.mrf.mxu1 }
 0x1e4   :  { %v385_v52 = vpack.c.bf16 %v384_v50, %v384_v50 }
 0x1e5   :  { %v622_v53 = vpop.f32.mrf.mxu1 }
 0x1e6   :  { %640 = vmatmul.mubr.bf16.vlgmr.msra.gmra.mxu0 %v385_v52 }
 0x2a6   :  { %v491_v55 = vpop.f32.mrf.mxu0 }
 0x2a7   :  { %v492_v56 = vadd.f32 %v554_v54, %v491_v55 }
 0x2a8   :  { %v641_v57 = vpop.f32.mrf.mxu0 }
 0x2a9   :  { %v498_v58 = vsel %vm497_vm1, %v492_v56, -inf }
 0x2aa   :  { %499 = vmax.xlane.f32.xlu0 %v498_v58  ;;  %v494_v59 = vpop.f32.mrf.mxu0 }
 0x2ac   :  { %v642_v60 = vpop.f32.mrf.mxu0 }
 0x333   :  { %v500_v61 = vpop.xlane.xlu0 %499 }
 0x334   :  { %v501_v62 = vsub.f32 %v492_v56, %v500_v61 }
 0x336   :  { %v502_v63 = vmul.f32 1.442695, %v501_v62 }
 0x338   :  { %684 = vpow2.f32 %v502_v63 }
 0x345   :  { %v685_v0 = vpop.eup %684 }
 0x346   :  { %v504_v1 = vsel %vm497_vm1, %v685_v0, 0.0 }
 0x347   :  { %505 = vadd.xlane.f32.xlu0 %v504_v1 }
 0x3d0   :  { %v506_v2 = vpop.xlane.xlu0 %505 }
 0x3d1   :  { %686 = vrcp.f32 %v506_v2 }
 0x3de   :  { %v687_v3 = vpop.eup %686 }
 0x3df   :  { %v508_v4 = vmul.f32 %v687_v3, %v685_v0 }
 0x3e1   :  { %509 = vst [vmem:[#allocation10] sm:$0x3] %v508_v4 }
 0x3e2   :  { %782 = shalt.err (!%p779_p10)
}
 0x3e3   :  { %519 = dma.vmem_to_hbm [thread:$0]  %s517_s25, 32, %s906_s7, [#allocation4]  }
 0x3e4   :  { %797 = dma.done.wait [#allocation4], 32  }
 0x3e5   :  { %798 = vsyncadd [#allocation4], 4294967264 }
 0x3e6   :  { %523 = vsyncpa [#allocation3], 1 }
 0x3e7   :  { %524 = vsyncpa [#allocation6], 1 }
 0x3e8   :  { %525 = vsyncpa [#allocation9], 1 }
 0x3e9   :  { %526 = vsyncpa [#allocation4], 1 }

</bundles_post_ra>
